<compile_context>
chip_gen: v6e
topology: v6e:2x2x1
jax: 0.10.0
libtpu: 0.0.40
codegen_flags: <defaults>
</compile_context>

<pallas_src>
import jax
import jax.numpy as jnp
from jax.experimental import pallas as pl
from jax.experimental.pallas import tpu as pltpu

# Small synthetic dimensions consistent with the module's __init__.
S_ENC_OUT_DIM = 32   # s_enc_out_dim
MAX_LEN       = 16   # max_len (BERT token sequence length)
INV_H_DIM     = 32   # inv_h_dim
FWD_H_DIM     = 32   # fwd_h_dim
A_DIM         = 16   # a_dim

LANES   = 128        # lane-padded feature width used everywhere in-kernel
BLOCK_B = 128        # batch-tile rows per grid step


def icm_heads_kernel(x_ref, w_ref, b_ref, out_ref):
    """One batch tile of both MLP heads, fused as a block-diagonal 128-lane net.

    x_ref : (Bt, 128)  lanes [0:32]=phi_s, [32:64]=phi_ns, [64:80]=act_tok, rest 0
    w_ref : (384, 128) rows [0:128]=W1, [128:256]=W2, [256:384]=W3 (block-diag packed)
    b_ref : (8, 128)   rows 0,1,2 = b1, b2, b3 (lane-packed), rest 0
    out   : (Bt, 128)  lanes [0:16]=sigmoid(inv logits), [16:48]=phi_ns_est, rest junk/0
    """
    f32 = jnp.float32
    x = x_ref[...]

    w1 = w_ref[0:LANES, :]
    w2 = w_ref[LANES:2 * LANES, :]
    w3 = w_ref[2 * LANES:3 * LANES, :]
    b1 = b_ref[0:1, :]
    b2 = b_ref[1:2, :]
    b3 = b_ref[2:3, :]

    # Layer 1 of both heads (cat realized by zero-padded weight row blocks).
    h = jnp.dot(x, w1, preferred_element_type=f32) + b1
    h = jnp.maximum(h, 0.0)
    # Layer 2 (block-diagonal: inv hidden in lanes 0:32, fwd hidden in 32:64).
    h = jnp.dot(h, w2, preferred_element_type=f32) + b2
    h = jnp.maximum(h, 0.0)
    # Layer 3 -> lanes 0:16 inv logits, lanes 16:48 phi_next_state_est.
    z = jnp.dot(h, w3, preferred_element_type=f32) + b3

    lane = jax.lax.broadcasted_iota(jnp.int32, z.shape, 1)
    out_ref[...] = jnp.where(lane < A_DIM, jax.nn.sigmoid(z), z)


def pack_inputs(phi_state, phi_next_state, action_tokens):
    """Lane-pack the three activation inputs into one (B, 128) slab."""
    B = phi_state.shape[0]
    S, L = S_ENC_OUT_DIM, MAX_LEN
    x = jnp.zeros((B, LANES), jnp.float32)
    x = x.at[:, 0:S].set(phi_state.astype(jnp.float32))
    x = x.at[:, S:2 * S].set(phi_next_state.astype(jnp.float32))
    x = x.at[:, 2 * S:2 * S + L].set(action_tokens.astype(jnp.float32))
    return x


def pack_params(p):
    """Pack the 14 weight/bias arrays into one (384,128) weight slab and one
    (8,128) bias slab, block-diagonal over the two heads, zero-padded to 128 lanes.
    """
    S, L, Hi, Hf, A = S_ENC_OUT_DIM, MAX_LEN, INV_H_DIM, FWD_H_DIM, A_DIM
    W = jnp.zeros((3 * LANES, LANES), jnp.float32)
    # --- layer 1 ---
    # inverse head: input lanes [0:32]=phi_s, [32:64]=phi_ns -> output lanes [0:Hi]
    W = W.at[0:S, 0:Hi].set(p["iw1a"])
    W = W.at[S:2 * S, 0:Hi].set(p["iw1b"])
    # forward head: input lanes [0:32]=phi_s, [64:80]=act_tok -> output lanes [Hi:Hi+Hf]
    W = W.at[0:S, Hi:Hi + Hf].set(p["fw1a"])
    W = W.at[2 * S:2 * S + L, Hi:Hi + Hf].set(p["fw1b"])
    # --- layer 2 (block diagonal) ---
    W = W.at[LANES + 0:LANES + Hi, 0:Hi].set(p["iw2"])
    W = W.at[LANES + Hi:LANES + Hi + Hf, Hi:Hi + Hf].set(p["fw2"])
    # --- layer 3 (inv -> lanes [0:A], fwd -> lanes [A:A+S]) ---
    W = W.at[2 * LANES + 0:2 * LANES + Hi, 0:A].set(p["iw3"])
    W = W.at[2 * LANES + Hi:2 * LANES + Hi + Hf, A:A + S].set(p["fw3"])

    Bslab = jnp.zeros((8, LANES), jnp.float32)
    Bslab = Bslab.at[0, 0:Hi].set(p["ib1"][0])
    Bslab = Bslab.at[0, Hi:Hi + Hf].set(p["fb1"][0])
    Bslab = Bslab.at[1, 0:Hi].set(p["ib2"][0])
    Bslab = Bslab.at[1, Hi:Hi + Hf].set(p["fb2"][0])
    Bslab = Bslab.at[2, 0:A].set(p["ib3"][0])
    Bslab = Bslab.at[2, A:A + S].set(p["fb3"][0])
    return W, Bslab


def icm_utt_heads(phi_state, phi_next_state, action_tokens, w_slab, b_slab,
                  *, block_b=BLOCK_B):
    """Runs inv_head + fwd_head of ICM_UTT.forward() for a batch of rows.

    phi_state, phi_next_state : (B, S_ENC_OUT_DIM) float32
    action_tokens             : (B, MAX_LEN)       float32 (token ids cast to float)
    Returns (action_vec_est (B, A_DIM), phi_next_state_est (B, S_ENC_OUT_DIM)).
    """
    B = phi_state.shape[0]
    x = pack_inputs(phi_state, phi_next_state, action_tokens)
    B_pad = -(-B // block_b) * block_b
    if B_pad != B:
        x = jnp.pad(x, ((0, B_pad - B), (0, 0)))

    out = pl.pallas_call(
        icm_heads_kernel,
        out_shape=jax.ShapeDtypeStruct((B_pad, LANES), jnp.float32),
        grid_spec=pltpu.PrefetchScalarGridSpec(
            num_scalar_prefetch=0,
            grid=(B_pad // block_b,),
            in_specs=[
                pl.BlockSpec((block_b, LANES), lambda i: (i, 0)),      # activations
                pl.BlockSpec((3 * LANES, LANES), lambda i: (0, 0)),    # weight slab
                pl.BlockSpec((8, LANES), lambda i: (0, 0)),            # bias slab
            ],
            out_specs=pl.BlockSpec((block_b, LANES), lambda i: (i, 0)),
        ),
        compiler_params=pltpu.CompilerParams(
            dimension_semantics=("parallel",)),
    )(x, w_slab, b_slab)

    act_est = out[:B, 0:A_DIM]
    phi_ns_est = out[:B, A_DIM:A_DIM + S_ENC_OUT_DIM]
    return act_est, phi_ns_est


def init_params(key):
    """Deterministic synthetic weights mirroring the nn.Sequential shapes.

    inv_head: Linear(2S, Hi) -> ReLU -> Linear(Hi, Hi) -> ReLU -> Linear(Hi, A)
    fwd_head: Linear(S + L, Hf) -> ReLU -> Linear(Hf, Hf) -> ReLU -> Linear(Hf, S)
    First layer of each head split (W1a / W1b) along the input dim to match the
    torch.cat order in the PyTorch forward.
    """
    ks = jax.random.split(key, 14)
    s = 0.1
    S, L, Hi, Hf, A = S_ENC_OUT_DIM, MAX_LEN, INV_H_DIM, FWD_H_DIM, A_DIM
    return {
        # inverse head
        "iw1a": s * jax.random.normal(ks[0], (S, Hi), jnp.float32),   # phi_state part
        "iw1b": s * jax.random.normal(ks[1], (S, Hi), jnp.float32),   # phi_next_state part
        "ib1":  s * jax.random.normal(ks[2], (1, Hi), jnp.float32),
        "iw2":  s * jax.random.normal(ks[3], (Hi, Hi), jnp.float32),
        "ib2":  s * jax.random.normal(ks[4], (1, Hi), jnp.float32),
        "iw3":  s * jax.random.normal(ks[5], (Hi, A), jnp.float32),
        "ib3":  s * jax.random.normal(ks[6], (1, A), jnp.float32),
        # forward head
        "fw1a": s * jax.random.normal(ks[7], (S, Hf), jnp.float32),   # phi_state part
        "fw1b": s * jax.random.normal(ks[8], (L, Hf), jnp.float32),   # action-token part
        "fb1":  s * jax.random.normal(ks[9], (1, Hf), jnp.float32),
        "fw2":  s * jax.random.normal(ks[10], (Hf, Hf), jnp.float32),
        "fb2":  s * jax.random.normal(ks[11], (1, Hf), jnp.float32),
        "fw3":  s * jax.random.normal(ks[12], (Hf, S), jnp.float32),
        "fb3":  s * jax.random.normal(ks[13], (1, S), jnp.float32),
    }


def reference(phi_s, phi_ns, act_tok, p):
    """Plain-JAX reference matching the PyTorch forward semantics (batched)."""
    phi_cat = jnp.concatenate([phi_s, phi_ns], axis=-1)            # (B, 2S)
    w1 = jnp.concatenate([p["iw1a"], p["iw1b"]], axis=0)
    h = jnp.maximum(phi_cat @ w1 + p["ib1"], 0.0)
    h = jnp.maximum(h @ p["iw2"] + p["ib2"], 0.0)
    act_est = jax.nn.sigmoid(h @ p["iw3"] + p["ib3"])

    sa_cat = jnp.concatenate([phi_s, act_tok], axis=-1)            # (B, S+L)
    fw1 = jnp.concatenate([p["fw1a"], p["fw1b"]], axis=0)
    g = jnp.maximum(sa_cat @ fw1 + p["fb1"], 0.0)
    g = jnp.maximum(g @ p["fw2"] + p["fb2"], 0.0)
    phi_ns_est = g @ p["fw3"] + p["fb3"]
    return act_est, phi_ns_est


if __name__ == "__main__":
    key = jax.random.PRNGKey(0)
    k_phi_s, k_phi_ns, k_tok, k_params = jax.random.split(key, 4)

    # Batched stand-ins for the BERT encoder outputs and tokenized action utts.
    # TODO(synk): BERT state_encoder / tokenizer / NLG outputs synthesized here.
    B = 256
    phi_state = jax.random.normal(k_phi_s, (B, S_ENC_OUT_DIM), jnp.float32)
    phi_next_state = jax.random.normal(k_phi_ns, (B, S_ENC_OUT_DIM), jnp.float32)
    action_token_ids = jax.random.randint(k_tok, (B, MAX_LEN), 0, 30522)
    action_tokens = action_token_ids.astype(jnp.float32)

    params = init_params(k_params)
    w_slab, b_slab = pack_params(params)

    # Batched call (grid of B/128 tiles, parallel batch axis).
    act_est, phi_ns_est = icm_utt_heads(phi_state, phi_next_state,
                                        action_tokens, w_slab, b_slab)
    jax.block_until_ready((act_est, phi_ns_est))

    ref_act, ref_phi = reference(phi_state, phi_next_state, action_tokens, params)
    assert act_est.shape == (B, A_DIM)
    assert phi_ns_est.shape == (B, S_ENC_OUT_DIM)
    assert jnp.allclose(act_est, ref_act, atol=2e-5, rtol=1e-5)
    assert jnp.allclose(phi_ns_est, ref_phi, atol=1e-3, rtol=1e-4)

    # Original module semantics (one utterance per call) still supported via
    # the batch-padding path in the wrapper.
    a1, p1 = icm_utt_heads(phi_state[:1], phi_next_state[:1],
                           action_tokens[:1], w_slab, b_slab)
    jax.block_until_ready((a1, p1))
    assert a1.shape == (1, A_DIM) and p1.shape == (1, S_ENC_OUT_DIM)
    assert jnp.allclose(a1, act_est[:1], atol=1e-6, rtol=1e-6)
    assert jnp.allclose(p1, phi_ns_est[:1], atol=1e-4, rtol=1e-6)

    print("KERNEL_OK")
</pallas_src>

<mosaic_0001>
module attributes {stable_mosaic.version = 11 : i64} {
  func.func @icm_heads_kernel(%arg0: i32, %arg1: memref<128x128xf32, #tpu.memory_space<vmem>>, %arg2: memref<384x128xf32, #tpu.memory_space<vmem>>, %arg3: memref<8x128xf32, #tpu.memory_space<vmem>>, %arg4: memref<128x128xf32, #tpu.memory_space<vmem>>) attributes {dimension_semantics = [#tpu.dimension_semantics<parallel>], iteration_bounds = array<i64: 2>, scalar_prefetch = 0 : i64, scratch_operands = 0 : i64, tpu.core_type = #tpu.core_type<tc>, window_params = [{transform_indices = @transform_0, window_bounds = array<i64: 128, 128>}, {pipeline_mode = #tpu.pipeline_mode<synchronous>, transform_indices = @transform_1, window_bounds = array<i64: 384, 128>}, {pipeline_mode = #tpu.pipeline_mode<synchronous>, transform_indices = @transform_2, window_bounds = array<i64: 8, 128>}, {transform_indices = @transform_3, window_bounds = array<i64: 128, 128>}]} {
    %c0 = arith.constant 0 : index
    %c0_0 = arith.constant 0 : index
    %0 = vector.load %arg1[%c0, %c0_0] : memref<128x128xf32, #tpu.memory_space<vmem>>, vector<128x128xf32>
    %c0_1 = arith.constant 0 : index
    %c0_2 = arith.constant 0 : index
    %1 = vector.load %arg2[%c0_1, %c0_2] : memref<384x128xf32, #tpu.memory_space<vmem>>, vector<128x128xf32>
    %c128 = arith.constant 128 : index
    %c0_3 = arith.constant 0 : index
    %2 = vector.load %arg2[%c128, %c0_3] : memref<384x128xf32, #tpu.memory_space<vmem>>, vector<128x128xf32>
    %c256 = arith.constant 256 : index
    %c0_4 = arith.constant 0 : index
    %3 = vector.load %arg2[%c256, %c0_4] : memref<384x128xf32, #tpu.memory_space<vmem>>, vector<128x128xf32>
    %c0_5 = arith.constant 0 : index
    %c0_6 = arith.constant 0 : index
    %4 = vector.load %arg3[%c0_5, %c0_6] : memref<8x128xf32, #tpu.memory_space<vmem>>, vector<1x128xf32>
    %c1 = arith.constant 1 : index
    %c0_7 = arith.constant 0 : index
    %5 = vector.load %arg3[%c1, %c0_7] : memref<8x128xf32, #tpu.memory_space<vmem>>, vector<1x128xf32>
    %c2 = arith.constant 2 : index
    %c0_8 = arith.constant 0 : index
    %6 = vector.load %arg3[%c2, %c0_8] : memref<8x128xf32, #tpu.memory_space<vmem>>, vector<1x128xf32>
    %cst = arith.constant dense<0.000000e+00> : vector<128x128xf32>
    %7 = tpu.matmul %0, %1, %cst {dimension_numbers = #tpu.dot_dimension_numbers<[1], [0], [0], [1], [0, 0, 1, 1], [], []>} : vector<128x128xf32>, vector<128x128xf32>, vector<128x128xf32> -> vector<128x128xf32>
    %8 = vector.broadcast %4 : vector<1x128xf32> to vector<128x128xf32>
    %9 = arith.addf %7, %8 : vector<128x128xf32>
    %cst_9 = arith.constant 0.000000e+00 : f32
    %10 = vector.broadcast %cst_9 : f32 to vector<128x128xf32>
    %11 = arith.maximumf %9, %10 : vector<128x128xf32>
    %cst_10 = arith.constant dense<0.000000e+00> : vector<128x128xf32>
    %12 = tpu.matmul %11, %2, %cst_10 {dimension_numbers = #tpu.dot_dimension_numbers<[1], [0], [0], [1], [0, 0, 1, 1], [], []>} : vector<128x128xf32>, vector<128x128xf32>, vector<128x128xf32> -> vector<128x128xf32>
    %13 = vector.broadcast %5 : vector<1x128xf32> to vector<128x128xf32>
    %14 = arith.addf %12, %13 : vector<128x128xf32>
    %cst_11 = arith.constant 0.000000e+00 : f32
    %15 = vector.broadcast %cst_11 : f32 to vector<128x128xf32>
    %16 = arith.maximumf %14, %15 : vector<128x128xf32>
    %cst_12 = arith.constant dense<0.000000e+00> : vector<128x128xf32>
    %17 = tpu.matmul %16, %3, %cst_12 {dimension_numbers = #tpu.dot_dimension_numbers<[1], [0], [0], [1], [0, 0, 1, 1], [], []>} : vector<128x128xf32>, vector<128x128xf32>, vector<128x128xf32> -> vector<128x128xf32>
    %18 = vector.broadcast %6 : vector<1x128xf32> to vector<128x128xf32>
    %19 = arith.addf %17, %18 : vector<128x128xf32>
    %20 = tpu.iota {dimensions = array<i32: 1>} : vector<128x128xi32>
    %c16_i32 = arith.constant 16 : i32
    %21 = vector.broadcast %c16_i32 : i32 to vector<128x128xi32>
    %22 = arith.cmpi slt, %20, %21 : vector<128x128xi32>
    %23 = arith.negf %19 : vector<128x128xf32>
    %24 = math.exp %23 : vector<128x128xf32>
    %cst_13 = arith.constant 1.000000e+00 : f32
    %25 = vector.broadcast %cst_13 : f32 to vector<128x128xf32>
    %26 = arith.addf %25, %24 : vector<128x128xf32>
    %27 = arith.divf %25, %26 : vector<128x128xf32>
    %28 = arith.select %22, %27, %19 : vector<128x128xi1>, vector<128x128xf32>
    %c0_14 = arith.constant 0 : index
    %c0_15 = arith.constant 0 : index
    %29 = vector.load %arg4[%c0_14, %c0_15] : memref<128x128xf32, #tpu.memory_space<vmem>>, vector<128x128xf32>
    tpu.vector_store %arg4[%c0_14, %c0_15], %28 {strides = array<i32>} : memref<128x128xf32, #tpu.memory_space<vmem>>, vector<128x128xf32>,
    return
  }
  func.func @transform_0(%arg0: i32) -> (i32, i32) {
    %c0_i32 = arith.constant 0 : i32
    %c0_i32_0 = arith.constant 0 : i32
    return %arg0, %c0_i32 : i32, i32
  }
  func.func @transform_1(%arg0: i32) -> (i32, i32) {
    %c0_i32 = arith.constant 0 : i32
    %c0_i32_0 = arith.constant 0 : i32
    %c0_i32_1 = arith.constant 0 : i32
    return %c0_i32, %c0_i32_0 : i32, i32
  }
  func.func @transform_2(%arg0: i32) -> (i32, i32) {
    %c0_i32 = arith.constant 0 : i32
    %c0_i32_0 = arith.constant 0 : i32
    %c0_i32_1 = arith.constant 0 : i32
    return %c0_i32, %c0_i32_0 : i32, i32
  }
  func.func @transform_3(%arg0: i32) -> (i32, i32) {
    %c0_i32 = arith.constant 0 : i32
    %c0_i32_0 = arith.constant 0 : i32
    return %arg0, %c0_i32 : i32, i32
  }
}

</mosaic_0001>

<bundles_post_ra>
// kernel: tpu_custom_call.1
= control target key start
LH: loop header
LB: loop body
LE: loop exit
PB: predicated region body
PF: predicated region fallthrough
CT: control target
= control target key end

     0   :  { %8 = vsyncpa [#allocation3], 0  ;;  %s2067_s0 = inlined_call_operand.hbm [shape: f32[256,128], index: 0, kind: input, shape index: {}]   ;;  %s2068_s1 = inlined_call_operand.hbm [shape: f32[384,128], index: 1, kind: input, shape index: {}]   ;;  %s2069_s2 = inlined_call_operand.hbm [shape: f32[8,128], index: 2, kind: input, shape index: {}]   ;;  %s2070_s3 = inlined_call_operand.hbm [shape: f32[256,128], index: 3, kind: output, shape index: {}]  }
   0x1   :  { %10 = vsyncpa [#allocation3 + $0x1], 0 }
   0x2   :  { %11 = vsyncpa [#allocation6], 0 }
   0x3   :  { %12 = vsyncpa [#allocation4], 0 }
   0x4   :  { %14 = vsyncpa [#allocation4 + $0x1], 0  ;;  %s1649_s12 = smov 0   ;;  %s1651_s13 = smov 0  }
   0x5   :  { %s1653_s14 = smov 0   ;;  %s1655_s15 = smov 0  }
   0x6 LB: > { %s1670_s16 = sadd.s32 4294967295, %s1619_s15   ;;  %s1001_s17 = sadd.s32 4294967294, %s1619_s15   ;;  %s1619_s15 = sphi %s1655_s15, %s2091_s15   ;;  %s1615_s14 = sphi %s1653_s14, %s2090_s14   ;;  %s1611_s13 = sphi %s1651_s13, %s2089_s13   ;;  %s1607_s12 = sphi %s1649_s12, %s2088_s12  }
   0x7   : > { %p40_p0 = scmp.ne.s32.totalorder %s1611_s13, %s1607_s12  ;;  %p2071_p1 = scmp.eq.s32.totalorder %s1670_s16, 0 }
   0x8   : > { %p106_p2 = scmp.eq.s32.totalorder %s1670_s16, 1  ;;  %p112_p3 = scmp.eq.s32.totalorder %s1001_s17, 1 }
   0x9   : > { %p1679_p4 = por %p2071_p1, %p40_p0  ;;  %p1002_p5 = scmp.ge.s32.totalorder %s1619_s15, 1 }
   0xa   : > { %p1684_p6 = por %p112_p3, %p40_p0  ;;  %p119_p7 = scmp.lt.s32.totalorder %s1619_s15, 3 }
   0xb   : > { %s2075_s18 = scalar_select %p1679_p4, 1, 0 }
   0xc   : > { %s2076_s19 = scalar_select %p1684_p6, 1, 0 }
   0xd   : > { %p1689_p8 = pnand %p1002_p5, %p119_p7  ;;  %s1621_s21 = smov [#allocation5]  }
   0xe   : > { %s131_s22 = sshll.u32 %s1621_s21, 4  ;;  %s1622_s24 = smov [#allocation7]   ;;  %s132_s22 = int_to_ptr.vmem [resolvable:$true] %s131_s22 }
   0xf   : > { %s2077_s20 = scalar_select %p1689_p8, 1, 0 }
  0x10   : > { %p1348_p9 = pneg %p1689_p8  ;;  %s145_s25 = sshll.u32 %s1622_s24, 4  ;;  %s146_s25 = int_to_ptr.vmem [resolvable:$true] %s145_s25 }
  0x11   : > { %s1482_s26 = scalar_lea.vmem %s132_s22, 6144  ;;  %p1490_p5 = scmp.lt.s32.totalorder %s132_s22, %s132_s22 }
  0x12   : > { %p1698_p11 = pnand %p1348_p9, %p2071_p1  ;;  %p1483_p13 = scmp.ne.s32.totalorder %s132_s22, %s1482_s26 }
  0x13   : > { %p1491_p7 = scmp.lt.s32.totalorder %s1482_s26, %s1482_s26 }
  0x14   : > { %p1473_p12 = pneg %p1698_p11 }
  0x15   : > { %p1492_p10 = por %p1491_p7, %p1490_p5 }
  0x16   : > { %p1485_p0 = pnand %p1483_p13, %p1473_p12 }
  0x18   : > { %p1486_p3 = pneg %p1485_p0 }
  0x1a   : > { %p1493_p9 = pnand %p1492_p10, %p1486_p3 }
  0x1c   : > { %1496 = shalt.err (!%p1493_p9)
}
  0x1d   : > { %s1623_s27 = smov 128   ;;  %s1624_s28 = smov 8  }
  0x1e   : > { %1351 = dma.hbm_to_vmem [thread:$0]  (!%p1698_p11), %s2068_s1, 6144, %s132_s22, [#allocation6], %s1623_s27, %s1623_s27, %s1624_s28  }
  0x1f   : > { %s1508_s4 = scalar_lea.vmem %s146_s25, 128  ;;  %p1516_p10 = scmp.lt.s32.totalorder %s146_s25, %s146_s25 }
  0x20   : > { %p1509_p13 = scmp.ne.s32.totalorder %s146_s25, %s1508_s4  ;;  %p1517_p3 = scmp.lt.s32.totalorder %s1508_s4, %s1508_s4 }
  0x22   : > { %p1511_p0 = pnand %p1509_p13, %p1473_p12  ;;  %p1518_p7 = por %p1517_p3, %p1516_p10 }
  0x24   : > { %p1512_p5 = pneg %p1511_p0 }
  0x26   : > { %p1519_p9 = pnand %p1518_p7, %p1512_p5 }
  0x28   : > { %1522 = shalt.err (!%p1519_p9)
}
  0x29   : > { %1354 = dma.hbm_to_vmem [thread:$0]  (!%p1698_p11), %s2069_s2, 128, %s146_s25, [#allocation6]  }
  0x2a   : > { %s1724_s7 = sadd.s32 1, %s1619_s15   ;;  %s27_s8 = sadd.s32 1, %s1615_s14 }
  0x2b   : > { %s24_s9 = ssub.s32 %s1619_s15, %s1724_s7  ;;  %p34_p12 = scmp.ne.s32.totalorder %s1615_s14, %s1611_s13 }
  0x2c   : > { %p25_p13 = scmp.eq.s32.totalorder %s24_s9, 0  ;;  %p35_p0 = scmp.eq.s32.totalorder %s1619_s15, 0 }
  0x2d   : > { %p1734_p5 = por %p106_p2, %p34_p12  ;;  %p1365_p10 = scmp.lt.s32.totalorder %s1619_s15, 2 }
  0x2e   : > { %s1740_s11 = scalar_select %p25_p13, %s1615_s14, %s27_s8  }
  0x2f   : > { %s2079_s10 = scalar_select %p1734_p5, 1, 0 }
  0x30   : > { %p36_p3 = por %p35_p0, %p34_p12  ;;  %s156_s17 = sand.u32 1, %s1615_s14  }
  0x31   : > { %s1006_s21 = sshll.u32 %s156_s17, 7  ;;  %s1038_s22 = sshll.u32 %s1619_s15, 11 }
  0x32   : > { %s1747_s25 = scalar_lea.hbm %s2067_s0, %s1038_s22  ;;  %s160_s26 = scalar_lea.vmem [#allocation2], %s1006_s21 }
  0x33   : > { %s167_s29 = sshll.u32 %s160_s26, 4  ;;  %p1751_p2 = pnand %p1365_p10, %p36_p3  ;;  %s1749_s29 = int_to_ptr.vmem [resolvable:$true] %s167_s29 }
  0x34   : > { %s1755_s4 = scalar_lea.sflag [#allocation3], %s156_s17  ;;  %s1523_s5 = scalar_lea.hbm %s1747_s25, 2048 }
  0x35   : > { %p1524_p11 = scmp.ne.s32.totalorder %s1747_s25, %s1523_s5  ;;  %p1525_p7 = pneg %p1751_p2 }
  0x36   : > { %s1528_s9 = scalar_lea.hbm %s2067_s0, 4096  ;;  %p1529_p13 = scmp.lt.s32.totalorder %s1747_s25, %s2067_s0 }
  0x37   : > { %p1526_p9 = pnand %p1525_p7, %p1524_p11  ;;  %p1530_p0 = scmp.lt.s32.totalorder %s1528_s9, %s1523_s5 }
  0x39   : > { %p1527_p12 = pneg %p1526_p9  ;;  %p1531_p10 = por %p1530_p0, %p1529_p13 }
  0x3b   : > { %p1532_p3 = pnand %p1531_p10, %p1527_p12 }
  0x3d   : > { %1535 = shalt.err (!%p1532_p3)
}
  0x3e   : > { %s1536_s17 = scalar_lea.vmem %s1749_s29, 2048  ;;  %s1625_s23 = smov [#allocation2]  }
  0x3f   : > { %p1537_p1 = scmp.ne.s32.totalorder %s1749_s29, %s1536_s17  ;;  %s1541_s24 = sshll.u32 %s1625_s23, 4  ;;  %s1542_s24 = int_to_ptr.vmem [resolvable:$false] %s1541_s24 }
  0x40   : > { %s1543_s26 = scalar_lea.vmem %s1542_s24, 4096  ;;  %p1544_p9 = scmp.lt.s32.totalorder %s1749_s29, %s1542_s24 }
  0x41   : > { %p1539_p6 = pnand %p1537_p1, %p1525_p7  ;;  %p1545_p5 = scmp.lt.s32.totalorder %s1543_s26, %s1536_s17 }
  0x43   : > { %p1540_p11 = pneg %p1539_p6  ;;  %p1546_p4 = por %p1545_p5, %p1544_p9 }
  0x45   : > { %p1547_p8 = pnand %p1546_p4, %p1540_p11 }
  0x47   : > { %1550 = shalt.err (!%p1547_p8)
}
  0x48   : > { %1358 = dma.hbm_to_vmem [thread:$0]  (!%p1751_p2), %s1747_s25, 2048, %s1749_s29, %s1755_s4, %s1623_s27, %s1623_s27, %s1624_s28  }
  0x49   : > { %p2081_p1 = scmp.ne.s32.totalorder %s2077_s20, 0 }
  0x4a   : > { %s1782_s5 = sand.u32 (!%p2081_p1), 1, %s1611_s13   ;;  %p2082_p4 = scmp.ne.s32.totalorder (!%p2081_p1), %s2075_s18, 0 }
  0x4b   : > { %179 = sbr.rel (%p2081_p1) target bundleno = 790 (0x316), region = 32  ;;  %s1010_s6 = sshll.u32 (!%p2081_p1), %s1782_s5, 7 }
  0x4c   : > { %s182_s8 = scalar_lea.sflag (!%p2081_p1), [#allocation3], %s1782_s5  ;;  %s1788_s30 = scalar_lea.vmem (!%p2081_p1), [#allocation2], %s1010_s6 }
  0x50   : > { %1594 = dma.done.wait (%p2082_p4), %s182_s8, 2048  }
  0x51   : > { %1596 = vsyncadd (%p2082_p4), %s182_s8, 4294965248  ;;  %p2083_p6 = scmp.eq.s32.totalorder %s1670_s16, 0 }
  0x53   : > { %1598 = dma.done.wait (%p2083_p6), [#allocation6], 6272   ;;  %p2084_p8 = pmov %p2083_p6 }
  0x54   : > { %v249_v0 = vld [vmem:[#allocation5 + $0x78] sm:$0xff]  ;;  %v248_v1 = vld [vmem:[#allocation5 + $0x70] sm:$0xff]  ;;  %v247_v2 = vld [vmem:[#allocation5 + $0x68] sm:$0xff]  ;;  %s1954_s18 = scalar_lea.vmem [#allocation8], %s1010_s6  ;;  %s1039_s20 = sshll.u32 %s1670_s16, 11 }
  0x55   : > { %1600 = vsyncadd (%p2084_p8), [#allocation6], 4294961024  ;;  %1136 = vmatprep.subr.mxu0 %v249_v0  ;;  %v246_v3 = vld [vmem:[#allocation5 + $0x60] sm:$0xff]  ;;  %v245_v5 = vld [vmem:[#allocation5 + $0x58] sm:$0xff]  ;;  %s909_s27 = sshll.u32 %s1954_s18, 4  ;;  %s2017_s29 = scalar_lea.hbm %s2070_s3, %s1039_s20  ;;  %s2019_s27 = int_to_ptr.vmem [resolvable:$true] %s909_s27 }
  0x56   : > { %1137 = vmatpush3.msra.mxu0 %v249_v0  ;;  %v218_v4 = vld [vmem:[%s1788_s30] sm:$0xff]  ;;  %v244_v6 = vld [vmem:[#allocation5 + $0x50] sm:$0xff]  ;;  %v243_v7 = vld [vmem:[#allocation5 + $0x48] sm:$0xff]  ;;  %s896_s16 = scalar_lea.sflag [#allocation4], %s1782_s5  ;;  %s1551_s4 = scalar_lea.vmem %s2019_s27, 2048 }
  0x57   : > { %1138 = vmatprep.subr.mxu0 %v248_v1  ;;  %1168 = vmatprep.mubr.f32.mxu0 %v218_v4  ;;  %v265_v8 = vld [vmem:[#allocation5 + $0xf8] sm:$0xff]  ;;  %v264_v9 = vld [vmem:[#allocation5 + $0xf0] sm:$0xff]  ;;  %v242_v10 = vld [vmem:[#allocation5 + $0x40] sm:$0xff]  ;;  %p1552_p5 = scmp.ne.s32.totalorder %s2019_s27, %s1551_s4  ;;  %p2085_p2 = scmp.ne.s32.totalorder %s2079_s10, 0 }
  0x58   : > { %1139 = vmatpush3.msra.mxu0 %v248_v1  ;;  %1192 = vmatprep.subr.mxu1 %v265_v8  ;;  %v263_v11 = vld [vmem:[#allocation5 + $0xe8] sm:$0xff]  ;;  %v241_v12 = vld [vmem:[#allocation5 + $0x38] sm:$0xff]  ;;  %v262_v13 = vld [vmem:[#allocation5 + $0xe0] sm:$0xff]  ;;  %s1626_s9 = smov [#allocation8]  }
  0x59   : > { %1140 = vmatprep.subr.mxu0 %v247_v2  ;;  %1193 = vmatpush3.msra.mxu1 %v265_v8  ;;  %v240_v14 = vld [vmem:[#allocation5 + $0x30] sm:$0xff]  ;;  %v261_v15 = vld [vmem:[#allocation5 + $0xd8] sm:$0xff]  ;;  %v239_v16 = vld [vmem:[#allocation5 + $0x28] sm:$0xff]  ;;  %p1553_p7 = pnand %p1552_p5, %p2085_p2  ;;  %s1555_s21 = sshll.u32 %s1626_s9, 4  ;;  %s1556_s21 = int_to_ptr.vmem [resolvable:$false] %s1555_s21 }
  0x5a   : > { %1141 = vmatpush3.msra.mxu0 %v247_v2  ;;  %1194 = vmatprep.subr.mxu1 %v264_v9  ;;  %v260_v17 = vld [vmem:[#allocation5 + $0xd0] sm:$0xff]  ;;  %v238_v18 = vld [vmem:[#allocation5 + $0x20] sm:$0xff]  ;;  %v259_v19 = vld [vmem:[#allocation5 + $0xc8] sm:$0xff]  ;;  %s1557_s22 = scalar_lea.vmem %s1556_s21, 4096  ;;  %p1558_p13 = scmp.lt.s32.totalorder %s2019_s27, %s1556_s21 }
  0x5b   : > { %1142 = vmatprep.subr.mxu0 %v246_v3  ;;  %1195 = vmatpush3.msra.mxu1 %v264_v9  ;;  %v237_v20 = vld [vmem:[#allocation5 + $0x18] sm:$0xff]  ;;  %v258_v21 = vld [vmem:[#allocation5 + $0xc0] sm:$0xff]  ;;  %v236_v22 = vld [vmem:[#allocation5 + $0x10] sm:$0xff]  ;;  %p1554_p12 = pneg %p1553_p7  ;;  %p1559_p0 = scmp.lt.s32.totalorder %s1557_s22, %s1551_s4 }
  0x5c   : > { %1143 = vmatpush3.msra.mxu0 %v246_v3  ;;  %1196 = vmatprep.subr.mxu1 %v263_v11  ;;  %v257_v23 = vld [vmem:[#allocation5 + $0xb8] sm:$0xff]  ;;  %v235_v24 = vld [vmem:[#allocation5 + $0x8] sm:$0xff]  ;;  %v256_v25 = vld [vmem:[#allocation5 + $0xb0] sm:$0xff] }
  0x5d   : > { %1144 = vmatprep.subr.mxu0 %v245_v5  ;;  %1197 = vmatpush3.msra.mxu1 %v263_v11  ;;  %v234_v26 = vld [vmem:[#allocation5] sm:$0xff]  ;;  %v255_v27 = vld [vmem:[#allocation5 + $0xa8] sm:$0xff]  ;;  %v220_v30 = vld [vmem:[%s1788_s30 + $0x10] sm:$0xff]  ;;  %p1560_p10 = por %p1559_p0, %p1558_p13 }
  0x5e   : > { %1145 = vmatpush3.msra.mxu0 %v245_v5  ;;  %1198 = vmatprep.subr.mxu1 %v262_v13  ;;  %v219_v28 = vld [vmem:[%s1788_s30 + $0x8] sm:$0xff]  ;;  %v254_v29 = vld [vmem:[#allocation5 + $0xa0] sm:$0xff]  ;;  %v221_v31 = vld [vmem:[%s1788_s30 + $0x18] sm:$0xff] }
  0x5f   : > { %1146 = vmatprep.subr.mxu0 %v244_v6  ;;  %1199 = vmatpush3.msra.mxu1 %v262_v13  ;;  %v222_v32 = vld [vmem:[%s1788_s30 + $0x20] sm:$0xff]  ;;  %v223_v33 = vld [vmem:[%s1788_s30 + $0x28] sm:$0xff]  ;;  %v224_v34 = vld [vmem:[%s1788_s30 + $0x30] sm:$0xff]  ;;  %p1561_p3 = pnand %p1560_p10, %p1554_p12 }
  0x60   : > { %1147 = vmatpush3.msra.mxu0 %v244_v6  ;;  %1200 = vmatprep.subr.mxu1 %v261_v15  ;;  %v225_v35 = vld [vmem:[%s1788_s30 + $0x38] sm:$0xff]  ;;  %v226_v36 = vld [vmem:[%s1788_s30 + $0x40] sm:$0xff]  ;;  %v227_v37 = vld [vmem:[%s1788_s30 + $0x48] sm:$0xff] }
  0x61   : > { %1148 = vmatprep.subr.mxu0 %v243_v7  ;;  %1201 = vmatpush3.msra.mxu1 %v261_v15  ;;  %v228_v38 = vld [vmem:[%s1788_s30 + $0x50] sm:$0xff]  ;;  %v229_v39 = vld [vmem:[%s1788_s30 + $0x58] sm:$0xff]  ;;  %v230_v40 = vld [vmem:[%s1788_s30 + $0x60] sm:$0xff] }
  0x62   : > { %1149 = vmatpush3.msra.mxu0 %v243_v7  ;;  %1202 = vmatprep.subr.mxu1 %v260_v17  ;;  %v231_v41 = vld [vmem:[%s1788_s30 + $0x68] sm:$0xff]  ;;  %v232_v42 = vld [vmem:[%s1788_s30 + $0x70] sm:$0xff]  ;;  %v233_v43 = vld [vmem:[%s1788_s30 + $0x78] sm:$0xff] }
  0x63   : > { %1150 = vmatprep.subr.mxu0 %v242_v10  ;;  %1203 = vmatpush3.msra.mxu1 %v260_v17  ;;  %v253_v44 = vld [vmem:[#allocation5 + $0x98] sm:$0xff]  ;;  %v252_v45 = vld [vmem:[#allocation5 + $0x90] sm:$0xff]  ;;  %v251_v46 = vld [vmem:[#allocation5 + $0x88] sm:$0xff] }
  0x64   : > { %1151 = vmatpush3.msra.mxu0 %v242_v10  ;;  %1204 = vmatprep.subr.mxu1 %v259_v19  ;;  %v250_v47 = vld [vmem:[#allocation5 + $0x80] sm:$0xff]  ;;  %v281_v48 = vld [vmem:[#allocation5 + $0x178] sm:$0xff]  ;;  %v280_v49 = vld [vmem:[#allocation5 + $0x170] sm:$0xff] }
  0x65   : > { %1152 = vmatprep.subr.mxu0 %v241_v12  ;;  %1205 = vmatpush3.msra.mxu1 %v259_v19  ;;  %v279_v50 = vld [vmem:[#allocation5 + $0x168] sm:$0xff]  ;;  %v278_v51 = vld [vmem:[#allocation5 + $0x160] sm:$0xff]  ;;  %v1814_v52 = vld [vmem:[#allocation5 + $0x158] sm:$0xff] }
  0x66   : > { %1153 = vmatpush3.msra.mxu0 %v241_v12  ;;  %1206 = vmatprep.subr.mxu1 %v258_v21  ;;  %v1816_v53 = vld [vmem:[#allocation5 + $0x150] sm:$0xff]  ;;  %v1820_v54 = vld [vmem:[#allocation5 + $0x148] sm:$0xff]  ;;  %v1824_v55 = vld [vmem:[#allocation5 + $0x140] sm:$0xff] }
  0x67   : > { %1154 = vmatprep.subr.mxu0 %v240_v14  ;;  %1207 = vmatpush3.msra.mxu1 %v258_v21  ;;  %v1828_v56 = vld [vmem:[#allocation5 + $0x138] sm:$0xff]  ;;  %v1832_v57 = vld [vmem:[#allocation5 + $0x130] sm:$0xff]  ;;  %v1836_v58 = vld [vmem:[#allocation5 + $0x128] sm:$0xff] }
  0x68   : > { %1155 = vmatpush3.msra.mxu0 %v240_v14  ;;  %1208 = vmatprep.subr.mxu1 %v257_v23  ;;  %v1840_v59 = vld [vmem:[#allocation5 + $0x120] sm:$0xff] }
  0x69   : > { %1156 = vmatprep.subr.mxu0 %v239_v16  ;;  %1209 = vmatpush3.msra.mxu1 %v257_v23  ;;  %v1846_v60 = vld [vmem:[#allocation7] ss:$0 sm:$0xff] }
  0x6a   : > { %1157 = vmatpush3.msra.mxu0 %v239_v16  ;;  %1210 = vmatprep.subr.mxu1 %v256_v25 }
  0x6b   : > { %1158 = vmatprep.subr.mxu0 %v238_v18  ;;  %1211 = vmatpush3.msra.mxu1 %v256_v25 }
  0x6c   : > { %1159 = vmatpush3.msra.mxu0 %v238_v18  ;;  %1212 = vmatprep.subr.mxu1 %v255_v27 }
  0x6d   : > { %1160 = vmatprep.subr.mxu0 %v237_v20  ;;  %1213 = vmatpush3.msra.mxu1 %v255_v27 }
  0x6e   : > { %1161 = vmatpush3.msra.mxu0 %v237_v20  ;;  %1214 = vmatprep.subr.mxu1 %v254_v29 }
  0x6f   : > { %1162 = vmatprep.subr.mxu0 %v236_v22  ;;  %1215 = vmatpush3.msra.mxu1 %v254_v29 }
  0x70   : > { %1163 = vmatpush3.msra.mxu0 %v236_v22  ;;  %1216 = vmatprep.subr.mxu1 %v253_v44 }
  0x71   : > { %1164 = vmatprep.subr.mxu0 %v235_v24  ;;  %1217 = vmatpush3.msra.mxu1 %v253_v44 }
  0x72   : > { %1165 = vmatpush3.msra.mxu0 %v235_v24  ;;  %1218 = vmatprep.subr.mxu1 %v252_v45 }
  0x73   : > { %1166 = vmatprep.subr.mxu0 %v234_v26  ;;  %1219 = vmatpush3.msra.mxu1 %v252_v45  ;;  %v269_v45 = vld [vmem:[#allocation5 + $0x118] sm:$0xff] }
  0x74   : > { %1167 = vmatpush3.msra.mxu0 %v234_v26  ;;  %1220 = vmatprep.subr.mxu1 %v251_v46 }
  0x75   : > { %1169 = vmatmul.mubr.f32.vlgmr.msra.gmra.mxu0 %v219_v28  ;;  %1221 = vmatpush3.msra.mxu1 %v251_v46  ;;  %v268_v46 = vld [vmem:[#allocation5 + $0x110] sm:$0xff] }
  0x76   : > { %1171 = vmatprep.mubr.f32.mxu0 %v220_v30  ;;  %1222 = vmatprep.subr.mxu1 %v250_v47 }
  0x77   : > { %1223 = vmatpush3.msra.mxu1 %v250_v47  ;;  %1248 = vmatprep.subr.mxu0 %v281_v48  ;;  %v267_v47 = vld [vmem:[#allocation5 + $0x108] sm:$0xff] }
  0x78   : > { %1304 = vmatprep.subr.mxu1 %v281_v48  ;;  %1249 = vmatpush3.msra.mxu0 %v281_v48 }
  0x79   : > { %1172 = vmatmul.mubr.f32.gmra.mxu0 %v221_v31  ;;  %1250 = vmatprep.subr.mxu0 %v280_v49 }
  0x7a   : > { %1174 = vmatprep.mubr.f32.mxu0 %v222_v32  ;;  %1251 = vmatpush3.msra.mxu0 %v280_v49 }
  0x7b   : > { %1252 = vmatprep.subr.mxu0 %v279_v50 }
  0x7c   : > { %1253 = vmatpush3.msra.mxu0 %v279_v50 }
  0x7d   : > { %1175 = vmatmul.mubr.f32.gmra.mxu0 %v223_v33  ;;  %1254 = vmatprep.subr.mxu0 %v278_v51 }
  0x7e   : > { %1177 = vmatprep.mubr.f32.mxu0 %v224_v34  ;;  %1255 = vmatpush3.msra.mxu0 %v278_v51 }
  0x7f   : > { %1256 = vmatprep.subr.mxu0 %v1814_v52 }
  0x80   : > { %1257 = vmatpush3.msra.mxu0 %v1814_v52 }
  0x81   : > { %1178 = vmatmul.mubr.f32.gmra.mxu0 %v225_v35  ;;  %1258 = vmatprep.subr.mxu0 %v1816_v53 }
  0x82   : > { %1180 = vmatprep.mubr.f32.mxu0 %v226_v36  ;;  %1259 = vmatpush3.msra.mxu0 %v1816_v53 }
  0x83   : > { %1260 = vmatprep.subr.mxu0 %v1820_v54 }
  0x84   : > { %1261 = vmatpush3.msra.mxu0 %v1820_v54 }
  0x85   : > { %1181 = vmatmul.mubr.f32.gmra.mxu0 %v227_v37  ;;  %1262 = vmatprep.subr.mxu0 %v1824_v55 }
  0x86   : > { %1183 = vmatprep.mubr.f32.mxu0 %v228_v38  ;;  %1263 = vmatpush3.msra.mxu0 %v1824_v55 }
  0x87   : > { %1264 = vmatprep.subr.mxu0 %v1828_v56 }
  0x88   : > { %1265 = vmatpush3.msra.mxu0 %v1828_v56 }
  0x89   : > { %1184 = vmatmul.mubr.f32.gmra.mxu0 %v229_v39  ;;  %1266 = vmatprep.subr.mxu0 %v1832_v57 }
  0x8a   : > { %1186 = vmatprep.mubr.f32.mxu0 %v230_v40  ;;  %1267 = vmatpush3.msra.mxu0 %v1832_v57 }
  0x8b   : > { %1268 = vmatprep.subr.mxu0 %v1836_v58 }
  0x8c   : > { %1269 = vmatpush3.msra.mxu0 %v1836_v58 }
  0x8d   : > { %1187 = vmatmul.mubr.f32.gmra.mxu0 %v231_v41  ;;  %1270 = vmatprep.subr.mxu0 %v1840_v59 }
  0x8e   : > { %1189 = vmatprep.mubr.f32.mxu0 %v232_v42  ;;  %1271 = vmatpush3.msra.mxu0 %v1840_v59 }
  0x8f   : > { %1272 = vmatprep.subr.mxu0 %v269_v45 }
  0x90   : > { %1273 = vmatpush3.msra.mxu0 %v269_v45 }
  0x91   : > { %1190 = vmatmul.mubr.f32.gmra.mxu0 %v233_v43  ;;  %1274 = vmatprep.subr.mxu0 %v268_v46 }
  0x92   : > { %1275 = vmatpush3.msra.mxu0 %v268_v46 }
  0x93   : > { %1276 = vmatprep.subr.mxu0 %v267_v47 }
  0x94   : > { %1277 = vmatpush3.msra.mxu0 %v267_v47 }
 0x135   : > { %v1170_v61 = vpop.f32.mrf.mxu0 }
 0x136   : > { %v361_v62 = vadd.f32 %v1170_v61, %v1846_v60 }
 0x137   : > { %v355_v63 = vpop.f32.mrf.mxu0 }
 0x138   : > { %v356_v0 = vadd.f32 %v1846_v60, %v355_v63  ;;  %v435_v3 = vmax.f32 %v361_v62, 0.0 }
 0x139   : > { %v1173_v1 = vpop.f32.mrf.mxu0 }
 0x13a   : > { %v434_v2 = vmax.f32 %v356_v0, 0.0  ;;  %v371_v4 = vadd.f32 %v1173_v1, %v1846_v60 }
 0x13b   : > { %v365_v5 = vpop.f32.mrf.mxu0 }
 0x13c   : > { %v366_v6 = vadd.f32 %v1846_v60, %v365_v5  ;;  %1224 = vmatprep.mubr.f32.mxu1 %v434_v2  ;;  %v437_v9 = vmax.f32 %v371_v4, 0.0 }
 0x13d   : > { %v1176_v7 = vpop.f32.mrf.mxu0  ;;  %1225 = vmatmul.mubr.f32.vlgmr.msra.gmra.mxu1 %v435_v3 }
 0x13e   : > { %v436_v8 = vmax.f32 %v366_v6, 0.0  ;;  %1320 = vmatpush3.msra.mxu1 %v281_v48  ;;  %v381_v10 = vadd.f32 %v1176_v7, %v1846_v60  ;;  %v266_v48 = vld [vmem:[#allocation5 + $0x100] sm:$0xff] }
 0x13f   : > { %v375_v11 = vpop.f32.mrf.mxu0  ;;  %1305 = vmatprep.subr.mxu1 %v280_v49  ;;  %1278 = vmatprep.subr.mxu0 %v266_v48 }
 0x140   : > { %v376_v12 = vadd.f32 %v1846_v60, %v375_v11  ;;  %1227 = vmatprep.mubr.f32.mxu1 %v436_v8  ;;  %1321 = vmatpush3.msra.mxu1 %v280_v49  ;;  %v439_v15 = vmax.f32 %v381_v10, 0.0  ;;  %v1015_v49 = vld [vmem:[#allocation7 + $0x1] ss:$0 sm:$0xff] }
 0x141   : > { %v1179_v13 = vpop.f32.mrf.mxu0  ;;  %1228 = vmatmul.mubr.f32.gmra.mxu1 %v437_v9  ;;  %1306 = vmatprep.subr.mxu1 %v279_v50 }
 0x142   : > { %v438_v14 = vmax.f32 %v376_v12, 0.0  ;;  %1322 = vmatpush3.msra.mxu1 %v279_v50  ;;  %v391_v16 = vadd.f32 %v1179_v13, %v1846_v60  ;;  %1279 = vmatpush3.msra.mxu0 %v266_v48 }
 0x143   : > { %v385_v17 = vpop.f32.mrf.mxu0  ;;  %1307 = vmatprep.subr.mxu1 %v278_v51 }
 0x144   : > { %v386_v18 = vadd.f32 %v1846_v60, %v385_v17  ;;  %1230 = vmatprep.mubr.f32.mxu1 %v438_v14  ;;  %1323 = vmatpush3.msra.mxu1 %v278_v51  ;;  %v441_v21 = vmax.f32 %v391_v16, 0.0 }
 0x145   : > { %v1182_v19 = vpop.f32.mrf.mxu0  ;;  %1231 = vmatmul.mubr.f32.gmra.mxu1 %v439_v15  ;;  %1308 = vmatprep.subr.mxu1 %v1814_v52 }
 0x146   : > { %v440_v20 = vmax.f32 %v386_v18, 0.0  ;;  %1324 = vmatpush3.msra.mxu1 %v1814_v52  ;;  %v401_v22 = vadd.f32 %v1182_v19, %v1846_v60 }
 0x147   : > { %v395_v23 = vpop.f32.mrf.mxu0  ;;  %1309 = vmatprep.subr.mxu1 %v1816_v53 }
 0x148   : > { %v396_v24 = vadd.f32 %v1846_v60, %v395_v23  ;;  %1233 = vmatprep.mubr.f32.mxu1 %v440_v20  ;;  %1325 = vmatpush3.msra.mxu1 %v1816_v53  ;;  %v443_v27 = vmax.f32 %v401_v22, 0.0 }
 0x149   : > { %v1185_v25 = vpop.f32.mrf.mxu0  ;;  %1234 = vmatmul.mubr.f32.gmra.mxu1 %v441_v21  ;;  %1310 = vmatprep.subr.mxu1 %v1820_v54 }
 0x14a   : > { %v442_v26 = vmax.f32 %v396_v24, 0.0  ;;  %1326 = vmatpush3.msra.mxu1 %v1820_v54  ;;  %v411_v28 = vadd.f32 %v1185_v25, %v1846_v60 }
 0x14b   : > { %v405_v29 = vpop.f32.mrf.mxu0  ;;  %1311 = vmatprep.subr.mxu1 %v1824_v55 }
 0x14c   : > { %v406_v30 = vadd.f32 %v1846_v60, %v405_v29  ;;  %1236 = vmatprep.mubr.f32.mxu1 %v442_v26  ;;  %1327 = vmatpush3.msra.mxu1 %v1824_v55  ;;  %v445_v33 = vmax.f32 %v411_v28, 0.0 }
 0x14d   : > { %v1188_v31 = vpop.f32.mrf.mxu0  ;;  %1237 = vmatmul.mubr.f32.gmra.mxu1 %v443_v27  ;;  %1312 = vmatprep.subr.mxu1 %v1828_v56 }
 0x14e   : > { %v444_v32 = vmax.f32 %v406_v30, 0.0  ;;  %1328 = vmatpush3.msra.mxu1 %v1828_v56  ;;  %v421_v34 = vadd.f32 %v1188_v31, %v1846_v60 }
 0x14f   : > { %v415_v35 = vpop.f32.mrf.mxu0  ;;  %1313 = vmatprep.subr.mxu1 %v1832_v57 }
 0x150   : > { %v416_v36 = vadd.f32 %v1846_v60, %v415_v35  ;;  %1239 = vmatprep.mubr.f32.mxu1 %v444_v32  ;;  %1329 = vmatpush3.msra.mxu1 %v1832_v57  ;;  %v447_v39 = vmax.f32 %v421_v34, 0.0  ;;  %v1880_v34 = vld [vmem:[#allocation7 + $0x2] ss:$0 sm:$0xff] }
 0x151   : > { %v1191_v37 = vpop.f32.mrf.mxu0  ;;  %1240 = vmatmul.mubr.f32.gmra.mxu1 %v445_v33  ;;  %1314 = vmatprep.subr.mxu1 %v1836_v58 }
 0x152   : > { %v446_v38 = vmax.f32 %v416_v36, 0.0  ;;  %1330 = vmatpush3.msra.mxu1 %v1836_v58  ;;  %v431_v40 = vadd.f32 %v1191_v37, %v1846_v60 }
 0x153   : > { %v425_v41 = vpop.f32.mrf.mxu0  ;;  %1315 = vmatprep.subr.mxu1 %v1840_v59 }
 0x154   : > { %v426_v42 = vadd.f32 %v1846_v60, %v425_v41  ;;  %1242 = vmatprep.mubr.f32.mxu1 %v446_v38  ;;  %1331 = vmatpush3.msra.mxu1 %v1840_v59  ;;  %v449_v44 = vmax.f32 %v431_v40, 0.0 }
 0x155   : > { %1243 = vmatmul.mubr.f32.gmra.mxu1 %v447_v39  ;;  %1316 = vmatprep.subr.mxu1 %v269_v45 }
 0x156   : > { %v448_v43 = vmax.f32 %v426_v42, 0.0  ;;  %1332 = vmatpush3.msra.mxu1 %v269_v45 }
 0x157   : > { %1317 = vmatprep.subr.mxu1 %v268_v46 }
 0x158   : > { %1245 = vmatprep.mubr.f32.mxu1 %v448_v43  ;;  %1333 = vmatpush3.msra.mxu1 %v268_v46 }
 0x159   : > { %1246 = vmatmul.mubr.f32.gmra.mxu1 %v449_v44  ;;  %1318 = vmatprep.subr.mxu1 %v267_v47 }
 0x15a   : > { %1334 = vmatpush3.msra.mxu1 %v267_v47 }
 0x15b   : > { %1319 = vmatprep.subr.mxu1 %v266_v48 }
 0x15c   : > { %1335 = vmatpush3.msra.mxu1 %v266_v48 }
 0x1fd   : > { %v1226_v50 = vpop.f32.mrf.mxu1 }
 0x1fe   : > { %v526_v51 = vadd.f32 %v1226_v50, %v1015_v49 }
 0x1ff   : > { %v520_v52 = vpop.f32.mrf.mxu1 }
 0x200   : > { %v521_v53 = vadd.f32 %v1015_v49, %v520_v52  ;;  %v600_v56 = vmax.f32 %v526_v51, 0.0 }
 0x201   : > { %v1229_v54 = vpop.f32.mrf.mxu1 }
 0x202   : > { %v599_v55 = vmax.f32 %v521_v53, 0.0  ;;  %v536_v57 = vadd.f32 %v1229_v54, %v1015_v49 }
 0x203   : > { %v530_v58 = vpop.f32.mrf.mxu1 }
 0x204   : > { %v531_v59 = vadd.f32 %v1015_v49, %v530_v58  ;;  %1280 = vmatprep.mubr.f32.mxu0 %v599_v55  ;;  %v602_v62 = vmax.f32 %v536_v57, 0.0 }
 0x205   : > { %v1232_v60 = vpop.f32.mrf.mxu1  ;;  %1281 = vmatmul.mubr.f32.vlgmr.msra.gmra.mxu0 %v600_v56 }
 0x206   : > { %v601_v61 = vmax.f32 %v531_v59, 0.0  ;;  %v546_v63 = vadd.f32 %v1232_v60, %v1015_v49 }
 0x207   : > { %v540_v0 = vpop.f32.mrf.mxu1 }
 0x208   : > { %v541_v1 = vadd.f32 %v1015_v49, %v540_v0  ;;  %1283 = vmatprep.mubr.f32.mxu0 %v601_v61  ;;  %v604_v4 = vmax.f32 %v546_v63, 0.0 }
 0x209   : > { %v1235_v2 = vpop.f32.mrf.mxu1  ;;  %1284 = vmatmul.mubr.f32.gmra.mxu0 %v602_v62 }
 0x20a   : > { %v603_v3 = vmax.f32 %v541_v1, 0.0  ;;  %v556_v5 = vadd.f32 %v1235_v2, %v1015_v49 }
 0x20b   : > { %v550_v6 = vpop.f32.mrf.mxu1 }
 0x20c   : > { %v551_v7 = vadd.f32 %v1015_v49, %v550_v6  ;;  %1286 = vmatprep.mubr.f32.mxu0 %v603_v3  ;;  %v606_v10 = vmax.f32 %v556_v5, 0.0 }
 0x20d   : > { %v1238_v8 = vpop.f32.mrf.mxu1  ;;  %1287 = vmatmul.mubr.f32.gmra.mxu0 %v604_v4 }
 0x20e   : > { %v605_v9 = vmax.f32 %v551_v7, 0.0  ;;  %v566_v11 = vadd.f32 %v1238_v8, %v1015_v49 }
 0x20f   : > { %v560_v12 = vpop.f32.mrf.mxu1 }
 0x210   : > { %v561_v13 = vadd.f32 %v1015_v49, %v560_v12  ;;  %1289 = vmatprep.mubr.f32.mxu0 %v605_v9  ;;  %v608_v16 = vmax.f32 %v566_v11, 0.0 }
 0x211   : > { %v1241_v14 = vpop.f32.mrf.mxu1  ;;  %1290 = vmatmul.mubr.f32.gmra.mxu0 %v606_v10 }
 0x212   : > { %v607_v15 = vmax.f32 %v561_v13, 0.0  ;;  %v576_v17 = vadd.f32 %v1241_v14, %v1015_v49  ;;  %v764_v13 = vlaneseq }
 0x213   : > { %v570_v18 = vpop.f32.mrf.mxu1 }
 0x214   : > { %v571_v19 = vadd.f32 %v1015_v49, %v570_v18  ;;  %1292 = vmatprep.mubr.f32.mxu1 %v607_v15  ;;  %v610_v22 = vmax.f32 %v576_v17, 0.0 }
 0x215   : > { %v1244_v20 = vpop.f32.mrf.mxu1  ;;  %1293 = vmatmul.mubr.f32.vlgmr.msra.gmra.mxu1 %v608_v16 }
 0x216   : > { %v609_v21 = vmax.f32 %v571_v19, 0.0  ;;  %v586_v23 = vadd.f32 %v1244_v20, %v1015_v49 }
 0x217   : > { %v580_v24 = vpop.f32.mrf.mxu1 }
 0x218   : > { %v581_v25 = vadd.f32 %v1015_v49, %v580_v24  ;;  %1295 = vmatprep.mubr.f32.mxu1 %v609_v21  ;;  %v612_v28 = vmax.f32 %v586_v23, 0.0  ;;  %v1937_v24 = vand.u32 127, %v764_v13 }
 0x219   : > { %v1247_v26 = vpop.f32.mrf.mxu1  ;;  %1296 = vmatmul.mubr.f32.gmra.mxu1 %v610_v22 }
 0x21a   : > { %v611_v27 = vmax.f32 %v581_v25, 0.0  ;;  %v596_v29 = vadd.f32 %v1247_v26, %v1015_v49  ;;  %vm766_vm0 = vcmp.lt.s32.totalorder %v1937_v24, 16 }
 0x21b   : > { %v590_v30 = vpop.f32.mrf.mxu1 }
 0x21c   : > { %v591_v31 = vadd.f32 %v1015_v49, %v590_v30  ;;  %1298 = vmatprep.mubr.f32.mxu1 %v611_v27  ;;  %v614_v33 = vmax.f32 %v596_v29, 0.0 }
 0x21d   : > { %1299 = vmatmul.mubr.f32.gmra.mxu1 %v612_v28 }
 0x21e   : > { %v613_v32 = vmax.f32 %v591_v31, 0.0 }
 0x220   : > { %1301 = vmatprep.mubr.f32.mxu1 %v613_v32 }
 0x221   : > { %1302 = vmatmul.mubr.f32.gmra.mxu1 %v614_v33 }
 0x2c5   : > { %v1282_v35 = vpop.f32.mrf.mxu0 }
 0x2c6   : > { %v1883_v36 = vadd.f32 %v1282_v35, %v1880_v34 }
 0x2c7   : > { %v685_v37 = vpop.f32.mrf.mxu0 }
 0x2c8   : > { %v1018_v38 = vmul.f32 -1.442695, %v1883_v36  ;;  %v1887_v39 = vadd.f32 %v1880_v34, %v685_v37 }
 0x2c9   : > { %v1285_v40 = vpop.f32.mrf.mxu0 }
 0x2ca   : > { %1407 = vpow2.f32 %v1018_v38  ;;  %v1017_v41 = vmul.f32 -1.442695, %v1887_v39  ;;  %v1891_v42 = vadd.f32 %v1285_v40, %v1880_v34 }
 0x2cb   : > { %v695_v43 = vpop.f32.mrf.mxu0 }
 0x2cc   : > { %1409 = vpow2.f32 %v1017_v41  ;;  %v1020_v44 = vmul.f32 -1.442695, %v1891_v42  ;;  %v1895_v45 = vadd.f32 %v1880_v34, %v695_v43 }
 0x2cd   : > { %v1288_v46 = vpop.f32.mrf.mxu0 }
 0x2ce   : > { %1411 = vpow2.f32 %v1020_v44  ;;  %v1019_v47 = vmul.f32 -1.442695, %v1895_v45  ;;  %v1899_v48 = vadd.f32 %v1288_v46, %v1880_v34 }
 0x2cf   : > { %v705_v49 = vpop.f32.mrf.mxu0 }
 0x2d0   : > { %1413 = vpow2.f32 %v1019_v47  ;;  %v1022_v50 = vmul.f32 -1.442695, %v1899_v48  ;;  %v1903_v51 = vadd.f32 %v1880_v34, %v705_v49 }
 0x2d1   : > { %v1291_v52 = vpop.f32.mrf.mxu0 }
 0x2d2   : > { %1415 = vpow2.f32 %v1022_v50  ;;  %v1021_v53 = vmul.f32 -1.442695, %v1903_v51  ;;  %v1907_v54 = vadd.f32 %v1291_v52, %v1880_v34 }
 0x2d3   : > { %v715_v55 = vpop.f32.mrf.mxu0 }
 0x2d4   : > { %1417 = vpow2.f32 %v1021_v53  ;;  %v1024_v56 = vmul.f32 -1.442695, %v1907_v54  ;;  %v1911_v57 = vadd.f32 %v1880_v34, %v715_v55 }
 0x2d5   : > { %v1294_v58 = vpop.f32.mrf.mxu1 }
 0x2d6   : > { %1419 = vpow2.f32 %v1024_v56  ;;  %v1023_v59 = vmul.f32 -1.442695, %v1911_v57  ;;  %v1915_v60 = vadd.f32 %v1294_v58, %v1880_v34 }
 0x2d7   : > { %v1408_v61 = vpop.eup %1407  ;;  %v725_v62 = vpop.f32.mrf.mxu1 }
 0x2d8   : > { %v816_v63 = vadd.f32 1.0, %v1408_v61  ;;  %1421 = vpow2.f32 %v1023_v59  ;;  %v1026_v0 = vmul.f32 -1.442695, %v1915_v60  ;;  %v1919_v1 = vadd.f32 %v1880_v34, %v725_v62 }
 0x2d9   : > { %v1410_v2 = vpop.eup %1409  ;;  %v1297_v3 = vpop.f32.mrf.mxu1 }
 0x2da   : > { %1423 = vrcp.f32 %v816_v63  ;;  %v815_v4 = vadd.f32 1.0, %v1410_v2  ;;  %v1025_v5 = vmul.f32 -1.442695, %v1919_v1  ;;  %v1923_v6 = vadd.f32 %v1297_v3, %v1880_v34 }
 0x2db   : > { %v1412_v7 = vpop.eup %1411  ;;  %1425 = vpow2.f32 %v1026_v0  ;;  %v735_v8 = vpop.f32.mrf.mxu1 }
 0x2dc   : > { %1427 = vrcp.f32 %v815_v4  ;;  %v818_v9 = vadd.f32 1.0, %v1412_v7  ;;  %v1028_v10 = vmul.f32 -1.442695, %v1923_v6  ;;  %v1927_v11 = vadd.f32 %v1880_v34, %v735_v8 }
 0x2dd   : > { %v1414_v12 = vpop.eup %1413  ;;  %1429 = vpow2.f32 %v1025_v5  ;;  %v1300_v14 = vpop.f32.mrf.mxu1 }
 0x2de   : > { %1431 = vrcp.f32 %v818_v9  ;;  %v817_v15 = vadd.f32 1.0, %v1414_v12  ;;  %v1027_v16 = vmul.f32 -1.442695, %v1927_v11  ;;  %v1931_v17 = vadd.f32 %v1300_v14, %v1880_v34 }
 0x2df   : > { %v1416_v18 = vpop.eup %1415  ;;  %1433 = vpow2.f32 %v1028_v10  ;;  %v745_v19 = vpop.f32.mrf.mxu1 }
 0x2e0   : > { %1435 = vrcp.f32 %v817_v15  ;;  %v820_v20 = vadd.f32 1.0, %v1416_v18  ;;  %v1030_v21 = vmul.f32 -1.442695, %v1931_v17  ;;  %v1935_v22 = vadd.f32 %v1880_v34, %v745_v19 }
 0x2e1   : > { %v1418_v23 = vpop.eup %1417  ;;  %1437 = vpow2.f32 %v1027_v16  ;;  %v1303_v25 = vpop.f32.mrf.mxu1 }
 0x2e2   : > { %1439 = vrcp.f32 %v820_v20  ;;  %v819_v26 = vadd.f32 1.0, %v1418_v23  ;;  %v1029_v27 = vmul.f32 -1.442695, %v1935_v22  ;;  %v1941_v28 = vadd.f32 %v1303_v25, %v1880_v34 }
 0x2e3   : > { %v1420_v29 = vpop.eup %1419  ;;  %1441 = vpow2.f32 %v1030_v21  ;;  %v755_v30 = vpop.f32.mrf.mxu1 }
 0x2e4   : > { %1443 = vrcp.f32 %v819_v26  ;;  %v822_v31 = vadd.f32 1.0, %v1420_v29  ;;  %v1032_v32 = vmul.f32 -1.442695, %v1941_v28  ;;  %v1945_v33 = vadd.f32 %v1880_v34, %v755_v30 }
 0x2e5   : > { %v1422_v35 = vpop.eup %1421  ;;  %1445 = vpow2.f32 %v1029_v27 }
 0x2e6   : > { %1447 = vrcp.f32 %v822_v31  ;;  %v821_v37 = vadd.f32 1.0, %v1422_v35  ;;  %v1031_v38 = vmul.f32 -1.442695, %v1945_v33 }
 0x2e7   : > { %v1424_v40 = vpop.eup %1423  ;;  %1449 = vpow2.f32 %v1032_v32 }
 0x2e8   : > { %v1426_v41 = vpop.eup %1425  ;;  %v864_v43 = vsel %vm766_vm0, %v1424_v40, %v1883_v36  ;;  %1451 = vrcp.f32 %v821_v37 }
 0x2e9   : > { %v1428_v44 = vpop.eup %1427  ;;  %880 = vst [vmem:[%s1954_s18 + $0x8] sm:$0xff] %v864_v43  ;;  %v824_v34 = vadd.f32 1.0, %v1426_v41  ;;  %1453 = vpow2.f32 %v1031_v38 }
 0x2ea   : > { %v1430_v46 = vpop.eup %1429  ;;  %v863_v47 = vsel %vm766_vm0, %v1428_v44, %v1887_v39 }
 0x2eb   : > { %v1432_v49 = vpop.eup %1431  ;;  %879 = vst [vmem:[%s1954_s18] sm:$0xff] %v863_v47  ;;  %1455 = vrcp.f32 %v824_v34  ;;  %v823_v36 = vadd.f32 1.0, %v1430_v46 }
 0x2ec   : > { %v1434_v50 = vpop.eup %1433  ;;  %v866_v52 = vsel %vm766_vm0, %v1432_v49, %v1891_v42 }
 0x2ed   : > { %v1436_v53 = vpop.eup %1435  ;;  %882 = vst [vmem:[%s1954_s18 + $0x18] sm:$0xff] %v866_v52  ;;  %1457 = vrcp.f32 %v823_v36  ;;  %v826_v55 = vadd.f32 1.0, %v1434_v50 }
 0x2ee   : > { %v1438_v56 = vpop.eup %1437  ;;  %v865_v39 = vsel %vm766_vm0, %v1436_v53, %v1895_v45 }
 0x2ef   : > { %v1440_v58 = vpop.eup %1439  ;;  %881 = vst [vmem:[%s1954_s18 + $0x10] sm:$0xff] %v865_v39  ;;  %1459 = vrcp.f32 %v826_v55  ;;  %v825_v59 = vadd.f32 1.0, %v1438_v56 }
 0x2f0   : > { %v1442_v61 = vpop.eup %1441  ;;  %v868_v42 = vsel %vm766_vm0, %v1440_v58, %v1899_v48 }
 0x2f1   : > { %v1444_v62 = vpop.eup %1443  ;;  %884 = vst [vmem:[%s1954_s18 + $0x28] sm:$0xff] %v868_v42  ;;  %1461 = vrcp.f32 %v825_v59  ;;  %v828_v63 = vadd.f32 1.0, %v1442_v61 }
 0x2f2   : > { %v1446_v0 = vpop.eup %1445  ;;  %v867_v45 = vsel %vm766_vm0, %v1444_v62, %v1903_v51 }
 0x2f3   : > { %v1448_v2 = vpop.eup %1447  ;;  %883 = vst [vmem:[%s1954_s18 + $0x20] sm:$0xff] %v867_v45  ;;  %1463 = vrcp.f32 %v828_v63  ;;  %v827_v3 = vadd.f32 1.0, %v1446_v0 }
 0x2f4   : > { %v1450_v4 = vpop.eup %1449  ;;  %v870_v48 = vsel %vm766_vm0, %v1448_v2, %v1907_v54 }
 0x2f5   : > { %v1452_v5 = vpop.eup %1451  ;;  %886 = vst [vmem:[%s1954_s18 + $0x38] sm:$0xff] %v870_v48  ;;  %1465 = vrcp.f32 %v827_v3  ;;  %v830_v7 = vadd.f32 1.0, %v1450_v4 }
 0x2f6   : > { %v1454_v8 = vpop.eup %1453  ;;  %v869_v51 = vsel %vm766_vm0, %v1452_v5, %v1911_v57 }
 0x2f7   : > { %885 = vst [vmem:[%s1954_s18 + $0x30] sm:$0xff] %v869_v51  ;;  %1467 = vrcp.f32 %v830_v7  ;;  %v829_v9 = vadd.f32 1.0, %v1454_v8 }
 0x2f8   : > { %v1456_v10 = vpop.eup %1455 }
 0x2f9   : > { %v872_v54 = vsel %vm766_vm0, %v1456_v10, %v1915_v60  ;;  %1469 = vrcp.f32 %v829_v9 }
 0x2fa   : > { %v1458_v12 = vpop.eup %1457  ;;  %888 = vst [vmem:[%s1954_s18 + $0x48] sm:$0xff] %v872_v54 }
 0x2fb   : > { %v871_v13 = vsel %vm766_vm0, %v1458_v12, %v1919_v1 }
 0x2fc   : > { %v1460_v57 = vpop.eup %1459  ;;  %887 = vst [vmem:[%s1954_s18 + $0x40] sm:$0xff] %v871_v13 }
 0x2fd   : > { %v874_v14 = vsel %vm766_vm0, %v1460_v57, %v1923_v6 }
 0x2fe   : > { %v1462_v15 = vpop.eup %1461  ;;  %890 = vst [vmem:[%s1954_s18 + $0x58] sm:$0xff] %v874_v14 }
 0x2ff   : > { %v873_v60 = vsel %vm766_vm0, %v1462_v15, %v1927_v11 }
 0x300   : > { %v1464_v16 = vpop.eup %1463  ;;  %889 = vst [vmem:[%s1954_s18 + $0x50] sm:$0xff] %v873_v60 }
 0x301   : > { %v876_v1 = vsel %vm766_vm0, %v1464_v16, %v1931_v17 }
 0x302   : > { %v1466_v18 = vpop.eup %1465  ;;  %892 = vst [vmem:[%s1954_s18 + $0x68] sm:$0xff] %v876_v1 }
 0x303   : > { %v875_v6 = vsel %vm766_vm0, %v1466_v18, %v1935_v22 }
 0x304   : > { %v1468_v19 = vpop.eup %1467  ;;  %891 = vst [vmem:[%s1954_s18 + $0x60] sm:$0xff] %v875_v6 }
 0x305   : > { %v878_v11 = vsel %vm766_vm0, %v1468_v19, %v1941_v28 }
 0x306   : > { %v1470_v17 = vpop.eup %1469  ;;  %894 = vst [vmem:[%s1954_s18 + $0x78] sm:$0xff] %v878_v11 }
 0x307   : > { %v877_v20 = vsel %vm766_vm0, %v1470_v17, %v1945_v33 }
 0x308   : > { %893 = vst [vmem:[%s1954_s18 + $0x70] sm:$0xff] %v877_v20 }
 0x309   : > { %1564 = shalt.err (!%p1561_p3)
}
 0x30a   : > { %s1565_s17 = scalar_lea.hbm %s2017_s29, 2048  ;;  %s1569_s26 = scalar_lea.hbm %s2070_s3, 4096 }
 0x30b   : > { %p1566_p11 = scmp.ne.s32.totalorder %s2017_s29, %s1565_s17  ;;  %p1570_p4 = scmp.lt.s32.totalorder %s2017_s29, %s2070_s3 }
 0x30c   : > { %p1571_p6 = scmp.lt.s32.totalorder %s1569_s26, %s1565_s17 }
 0x30d   : > { %p1567_p9 = pnand %p1566_p11, %p2085_p2 }
 0x30e   : > { %p1572_p8 = por %p1571_p6, %p1570_p4 }
 0x30f   : > { %p1568_p1 = pneg %p1567_p9 }
 0x311   : > { %p1573_p5 = pnand %p1572_p8, %p1568_p1 }
 0x313   : > { %1576 = shalt.err (!%p1573_p5)
}
 0x314   : > { %s1627_s30 = smov 128   ;;  %s1628_s18 = smov 8  }
 0x315   : > { %1346 = dma.vmem_to_hbm [thread:$0]  (%p2085_p2), %s2019_s27, 2048, %s2017_s29, %s896_s16, %s1627_s30, %s1627_s30, %s1628_s18  }
 0x316 PF: > { %s924_s20 = sand.u32 1, %s1607_s12   ;;  %p2086_p7 = scmp.ne.s32.totalorder %s2076_s19, 0 }
 0x317   : > { %p2087_p12 = scmp.ge.s32.totalorder %s1619_s15, 2  ;;  %s925_s28 = scalar_lea.sflag [#allocation4], %s924_s20 }
 0x319   : > { %p1360_p13 = pnand %p2087_p12, %p2086_p7 }
 0x31b   : > { %p1361_p0 = pneg %p1360_p13 }
 0x31d   : > { %1602 = dma.done.wait (%p1361_p0), %s925_s28, 2048  }
 0x31e   : > { %1604 = vsyncadd (%p1361_p0), %s925_s28, 4294965248  ;;  %p17_p10 = scmp.ge.s32.totalorder %s1724_s7, 4   ;;  %s2088_s12 = smov %s1611_s13 }
 0x31f   : > { %s2089_s13 = smov %s1615_s14  ;;  %s2090_s14 = smov %s1740_s11 }
 0x320   : > { %s2091_s15 = smov %s1724_s7  ;;  %19 = sbr.rel (!%p17_p10) target bundleno = 6 (0x6), region = 85 }
 0x325   :  { %930 = vsyncpa [#allocation3], 1 }
 0x326   :  { %932 = vsyncpa [#allocation3 + $0x1], 1 }
 0x327   :  { %933 = vsyncpa [#allocation6], 1 }
 0x328   :  { %934 = vsyncpa [#allocation4], 1 }
 0x329   :  { %936 = vsyncpa [#allocation4 + $0x1], 1 }

</bundles_post_ra>
